<compile_context>
chip_gen: v7x
topology: tpu7x:2x2x1
jax: 0.10.0
libtpu: 0.0.40
codegen_flags: <defaults>
</compile_context>

<pallas_src>
import functools

import jax
import jax.numpy as jnp
from jax.experimental import pallas as pl
from jax.experimental.pallas import tpu as pltpu


def _round_up(x: int, m: int) -> int:
    return ((x + m - 1) // m) * m


def _cdiv(a: int, b: int) -> int:
    return -(-a // b)


def _ter_avg_kernel(tok_ref, len_ref, emb_ref, out_ref, *, sc: int, n_chunks: int):
    # tok_ref: (TB, S_pad) int32   token ids for one batch tile
    # len_ref: (TB, 1)     float32 sequence lengths for the batch tile
    # emb_ref: (TN, E_pad) f32/bf16 one vocab tile of the embedding table
    # out_ref: (TB, E_pad) float32 output; doubles as the accumulator across
    #                              the vocab (reduction) grid axis.
    n = pl.program_id(1)
    tb = tok_ref.shape[0]
    tn = emb_ref.shape[0]

    @pl.when(n == 0)
    def _():
        out_ref[...] = jnp.zeros_like(out_ref)

    # Token ids covered by the resident vocab tile only (never the full vocab).
    vocab_ids = n * tn + jax.lax.broadcasted_iota(jnp.int32, (1, 1, tn), 2)

    # counts[b, t] = #{ s : toks[b, s] == (n*TN + t) }, built chunk-by-chunk so
    # the live compare intermediate is (TB, SC, TN) instead of (TB, S, TN).
    counts = jnp.zeros((tb, tn), jnp.float32)
    for c in range(n_chunks):                       # static trip count, unrolled
        tok_chunk = tok_ref[:, c * sc:(c + 1) * sc]             # (TB, SC) int32
        onehot = (tok_chunk[:, :, None] == vocab_ids).astype(jnp.float32)
        counts = counts + jnp.sum(onehot, axis=1)               # (TB, TN)

    if emb_ref.dtype != jnp.float32:
        # bf16 table path: counts are exact in bf16 for S <= 256.
        counts = counts.astype(emb_ref.dtype)

    # Contribution of this vocab tile: counts @ emb_tile on the MXU.
    out_ref[...] += jnp.dot(counts, emb_ref[...],
                            preferred_element_type=jnp.float32)

    @pl.when(n == pl.num_programs(1) - 1)
    def _():
        inv_len = pl.reciprocal(len_ref[...], approx=False)     # (TB, 1)
        out_ref[...] = out_ref[...] * inv_len


def make_ter_avg_encoder(emb_table,
                         *,
                         table_dtype=jnp.float32,
                         seq_chunk: int = 16,
                         stream_tn: int = 256,
                         resident_table_bytes: int = 8 * 2 ** 20):
    """Pad/cast the embedding table once; return an `encode(tokens, lengths)` fn."""
    ntoken, E = emb_table.shape
    E_pad = _round_up(E, 128)                       # lane-dense output / MXU N
    itemsize = jnp.dtype(table_dtype).itemsize

    n_resident = _round_up(ntoken, 8)
    if n_resident * E_pad * itemsize <= resident_table_bytes:
        # Whole table stays resident in VMEM: single vocab tile, fetched once
        # for the entire call (block index never changes) -> no re-streaming.
        TN = n_resident
        N_pad = n_resident
    else:
        # Stream the vocab as a reduction axis.  TN=256 = one MXU K pass on
        # v6e/v7x, multiple of 128 for v5e, and v7x-VMEM friendly.
        TN = stream_tn
        N_pad = _round_up(ntoken, TN)

    table_p = jnp.zeros((N_pad, E_pad), table_dtype)
    table_p = table_p.at[:ntoken, :E].set(emb_table.astype(table_dtype))

    def encode(tokens, lengths):
        tokens = jnp.asarray(tokens, jnp.int32)
        B, S = tokens.shape
        lengths = jnp.asarray(lengths, jnp.float32).reshape(B)

        # Sequence chunking parameters (static).
        sc = S if S <= seq_chunk else seq_chunk
        S_pad = _round_up(S, sc)
        n_chunks = S_pad // sc

        # Batch tile: >= 8 sublanes, <= 128; split once if a single tile would
        # cover the whole batch so v7x's two TensorCores both get work.
        TB = min(128, _round_up(B, 8))
        if TB == _round_up(B, 8) and TB >= 16:
            TB = _round_up(_cdiv(B, 2), 8)
        B_pad = _round_up(B, TB)

        # Pad tokens with id == N_pad (matches no vocab tile -> contributes 0).
        toks_p = jnp.full((B_pad, S_pad), N_pad, jnp.int32)
        toks_p = toks_p.at[:B, :S].set(tokens)
        lens_p = jnp.ones((B_pad, 1), jnp.float32).at[:B, 0].set(lengths)

        grid = (B_pad // TB, N_pad // TN)

        # Explicit scoped-VMEM budget from the real tile footprint (+ headroom).
        footprint = (2 * TB * S_pad * 4            # token tiles (double-buffered)
                     + 2 * TB * 4                  # length tiles
                     + 2 * TN * E_pad * itemsize   # table tiles
                     + 2 * TB * E_pad * 4          # output/accumulator tile
                     + TB * sc * TN * 4            # per-chunk compare intermediate
                     + 2 * TB * TN * 4)            # counts + temporaries
        vmem_limit = int(min(max(2 * footprint, 32 * 2 ** 20), 64 * 2 ** 20))

        kernel = functools.partial(_ter_avg_kernel, sc=sc, n_chunks=n_chunks)

        out = pl.pallas_call(
            kernel,
            out_shape=jax.ShapeDtypeStruct((B_pad, E_pad), jnp.float32),
            grid_spec=pltpu.PrefetchScalarGridSpec(
                num_scalar_prefetch=0,
                grid=grid,
                in_specs=[
                    pl.BlockSpec((TB, S_pad), lambda b, n: (b, 0)),   # tokens
                    pl.BlockSpec((TB, 1), lambda b, n: (b, 0)),       # lengths
                    pl.BlockSpec((TN, E_pad), lambda b, n: (n, 0)),   # table tile
                ],
                out_specs=pl.BlockSpec((TB, E_pad), lambda b, n: (b, 0)),
            ),
            compiler_params=pltpu.CompilerParams(
                dimension_semantics=("parallel", "arbitrary"),
                vmem_limit_bytes=vmem_limit,
            ),
        )(toks_p, lens_p, table_p)

        return out[:B, :E]

    return encode


if __name__ == "__main__":
    # Small shapes consistent with the module.
    ntoken, emb_size = 50, 32
    B, S = 2, 8

    key = jax.random.PRNGKey(0)
    k_emb, k_tok, k_len = jax.random.split(key, 3)

    # Mirrors nn.init.uniform_(weight, -0.1, 0.1) (applied to the whole table).
    emb_table = jax.random.uniform(
        k_emb, (ntoken, emb_size), dtype=jnp.float32, minval=-0.1, maxval=0.1
    )
    tokens = jax.random.randint(k_tok, (B, S), 0, ntoken, dtype=jnp.int32)
    lengths = jax.random.randint(k_len, (B,), 1, S + 1, dtype=jnp.int32)

    encoder = make_ter_avg_encoder(emb_table)          # table padded/cast once
    out = jax.block_until_ready(encoder(tokens, lengths))

    # Pure-JAX reference.
    ref = jnp.sum(emb_table[tokens], axis=1) / lengths[:, None].astype(jnp.float32)
    assert out.shape == (B, emb_size)
    assert jnp.allclose(out, ref, atol=1e-5, rtol=1e-5), "mismatch vs reference"

    print("KERNEL_OK")
</pallas_src>

<mosaic_0001>
module attributes {stable_mosaic.version = 11 : i64} {
  func.func @_ter_avg_kernel(%arg0: i32, %arg1: i32, %arg2: memref<8x8xi32, #tpu.memory_space<vmem>>, %arg3: memref<8x1xf32, #tpu.memory_space<vmem>>, %arg4: memref<56x128xf32, #tpu.memory_space<vmem>>, %arg5: memref<8x128xf32, #tpu.memory_space<vmem>>) attributes {dimension_semantics = [#tpu.dimension_semantics<parallel>, #tpu.dimension_semantics<arbitrary>], iteration_bounds = array<i64: 1, 1>, scalar_prefetch = 0 : i64, scratch_operands = 0 : i64, tpu.core_type = #tpu.core_type<tc>, window_params = [{transform_indices = @transform_0, window_bounds = array<i64: 8, 8>}, {transform_indices = @transform_1, window_bounds = array<i64: 8, 1>}, {transform_indices = @transform_2, window_bounds = array<i64: 56, 128>}, {transform_indices = @transform_3, window_bounds = array<i64: 8, 128>}]} {
    %c0_i32 = arith.constant 0 : i32
    %0 = arith.cmpi eq, %arg1, %c0_i32 : i32
    %1 = arith.extui %0 : i1 to i32
    %c0_i32_0 = arith.constant 0 : i32
    %2 = arith.cmpi ne, %1, %c0_i32_0 : i32
    scf.if %2 {
      %cst_12 = arith.constant 0.000000e+00 : f32
      %25 = vector.broadcast %cst_12 : f32 to vector<8x128xf32>
      %c0_13 = arith.constant 0 : index
      %c0_14 = arith.constant 0 : index
      %26 = vector.load %arg5[%c0_13, %c0_14] : memref<8x128xf32, #tpu.memory_space<vmem>>, vector<8x128xf32>
      tpu.vector_store %arg5[%c0_13, %c0_14], %25 {strides = array<i32>} : memref<8x128xf32, #tpu.memory_space<vmem>>, vector<8x128xf32>,
    } else {
    }
    %c56_i32 = arith.constant 56 : i32
    %3 = arith.muli %arg1, %c56_i32 : i32
    %4 = tpu.iota {dimensions = array<i32: 2>} : vector<1x1x56xi32>
    %5 = vector.broadcast %3 : i32 to vector<1x1x56xi32>
    %6 = arith.addi %5, %4 : vector<1x1x56xi32>
    %cst = arith.constant 0.000000e+00 : f32
    %7 = vector.broadcast %cst : f32 to vector<8x56xf32>
    %c0 = arith.constant 0 : index
    %c0_1 = arith.constant 0 : index
    %8 = vector.load %arg2[%c0, %c0_1] : memref<8x8xi32, #tpu.memory_space<vmem>>, vector<8x8xi32>
    %9 = vector.shape_cast %8 : vector<8x8xi32> to vector<8x8x1xi32>
    %10 = vector.broadcast %9 : vector<8x8x1xi32> to vector<8x8x56xi32>
    %11 = vector.broadcast %6 : vector<1x1x56xi32> to vector<8x8x56xi32>
    %12 = arith.cmpi eq, %10, %11 : vector<8x8x56xi32>
    %13 = arith.extui %12 : vector<8x8x56xi1> to vector<8x8x56xi32>
    %14 = arith.sitofp %13 : vector<8x8x56xi32> to vector<8x8x56xf32>
    %cst_2 = arith.constant dense<0.000000e+00> : vector<8x56xf32>
    %15 = vector.multi_reduction <add>, %14, %cst_2 [1] : vector<8x8x56xf32> to vector<8x56xf32>
    %16 = arith.addf %7, %15 : vector<8x56xf32>
    %c0_3 = arith.constant 0 : index
    %c0_4 = arith.constant 0 : index
    %17 = vector.load %arg5[%c0_3, %c0_4] : memref<8x128xf32, #tpu.memory_space<vmem>>, vector<8x128xf32>
    %c0_5 = arith.constant 0 : index
    %c0_6 = arith.constant 0 : index
    %18 = vector.load %arg4[%c0_5, %c0_6] : memref<56x128xf32, #tpu.memory_space<vmem>>, vector<56x128xf32>
    %cst_7 = arith.constant dense<0.000000e+00> : vector<8x128xf32>
    %19 = tpu.matmul %16, %18, %cst_7 {dimension_numbers = #tpu.dot_dimension_numbers<[1], [0], [0], [1], [0, 0, 1, 1], [], []>} : vector<8x56xf32>, vector<56x128xf32>, vector<8x128xf32> -> vector<8x128xf32>
    %20 = arith.addf %17, %19 : vector<8x128xf32>
    %c0_8 = arith.constant 0 : index
    %c0_9 = arith.constant 0 : index
    %21 = vector.load %arg5[%c0_8, %c0_9] : memref<8x128xf32, #tpu.memory_space<vmem>>, vector<8x128xf32>
    tpu.vector_store %arg5[%c0_8, %c0_9], %20 {strides = array<i32>} : memref<8x128xf32, #tpu.memory_space<vmem>>, vector<8x128xf32>,
    %c0_i32_10 = arith.constant 0 : i32
    %22 = arith.cmpi eq, %arg1, %c0_i32_10 : i32
    %23 = arith.extui %22 : i1 to i32
    %c0_i32_11 = arith.constant 0 : i32
    %24 = arith.cmpi ne, %23, %c0_i32_11 : i32
    scf.if %24 {
      %c0_12 = arith.constant 0 : index
      %c0_13 = arith.constant 0 : index
      %25 = vector.load %arg3[%c0_12, %c0_13] : memref<8x1xf32, #tpu.memory_space<vmem>>, vector<8x1xf32>
      %26 = tpu.reciprocal %25 : vector<8x1xf32> -> vector<8x1xf32>
      %c0_14 = arith.constant 0 : index
      %c0_15 = arith.constant 0 : index
      %27 = vector.load %arg5[%c0_14, %c0_15] : memref<8x128xf32, #tpu.memory_space<vmem>>, vector<8x128xf32>
      %28 = vector.broadcast %26 : vector<8x1xf32> to vector<8x128xf32>
      %29 = arith.mulf %27, %28 : vector<8x128xf32>
      %c0_16 = arith.constant 0 : index
      %c0_17 = arith.constant 0 : index
      %30 = vector.load %arg5[%c0_16, %c0_17] : memref<8x128xf32, #tpu.memory_space<vmem>>, vector<8x128xf32>
      tpu.vector_store %arg5[%c0_16, %c0_17], %29 {strides = array<i32>} : memref<8x128xf32, #tpu.memory_space<vmem>>, vector<8x128xf32>,
    } else {
    }
    return
  }
  func.func @transform_0(%arg0: i32, %arg1: i32) -> (i32, i32) {
    %c0_i32 = arith.constant 0 : i32
    %c0_i32_0 = arith.constant 0 : i32
    return %arg0, %c0_i32 : i32, i32
  }
  func.func @transform_1(%arg0: i32, %arg1: i32) -> (i32, i32) {
    %c0_i32 = arith.constant 0 : i32
    %c0_i32_0 = arith.constant 0 : i32
    return %arg0, %c0_i32 : i32, i32
  }
  func.func @transform_2(%arg0: i32, %arg1: i32) -> (i32, i32) {
    %c0_i32 = arith.constant 0 : i32
    %c0_i32_0 = arith.constant 0 : i32
    return %arg1, %c0_i32 : i32, i32
  }
  func.func @transform_3(%arg0: i32, %arg1: i32) -> (i32, i32) {
    %c0_i32 = arith.constant 0 : i32
    %c0_i32_0 = arith.constant 0 : i32
    return %arg0, %c0_i32 : i32, i32
  }
}

</mosaic_0001>

<bundles_post_ra>
// kernel: tpu_custom_call.1
= control target key start
LH: loop header
LB: loop body
LE: loop exit
PB: predicated region body
PF: predicated region fallthrough
CT: control target
= control target key end

     0   :  { %8 = vsyncpa [#allocation3], 0  ;;  %s498_s0 = inlined_call_operand.vmem [shape: s32[8,8], index: 0, kind: input, shape index: {}]   ;;  %s499_s1 = inlined_call_operand.vmem [shape: f32[8,1], index: 1, kind: input, shape index: {}]   ;;  %s500_s2 = inlined_call_operand.hbm [shape: f32[56,128], index: 2, kind: input, shape index: {}]   ;;  %s501_s3 = inlined_call_operand.hbm [shape: f32[8,128], index: 3, kind: output, shape index: {}]  }
   0x1   :  { %9 = vsyncpa [#allocation4], 0  ;;  %s419_s12 = smov [#allocation2]   ;;  %s371_s16 = scalar_lea.hbm %s500_s2, 896 }
   0x2   :  { %s19_s13 = sshll.u32 %s419_s12, 4  ;;  %p372_p0 = scmp.ne.s32.totalorder %s500_s2, %s371_s16  ;;  %s20_s13 = int_to_ptr.vmem [resolvable:$true] %s19_s13 }
   0x3   :  { %p375_p1 = scmp.lt.u32.totalorder %s371_s16, %s500_s2 }
   0x5   :  { %p377_p2 = pnand %p375_p1, %p372_p0 }
   0x7   :  { %380 = shalt.err (!%p377_p2)
}
   0x8   :  { %s381_s21 = scalar_lea.vmem %s20_s13, 896  ;;  %p386_p4 = scmp.lt.s32.totalorder %s20_s13, %s20_s13 }
   0x9   :  { %p382_p3 = scmp.ne.s32.totalorder %s20_s13, %s381_s21  ;;  %p387_p5 = scmp.lt.s32.totalorder %s381_s21, %s381_s21 }
   0xb   :  { %p388_p6 = por %p387_p5, %p386_p4 }
   0xd   :  { %p389_p7 = pnand %p388_p6, %p382_p3 }
   0xf   :  { %392 = shalt.err (!%p389_p7)
}
  0x10   :  { %s420_s22 = smov 128   ;;  %s421_s23 = smov 8  }
  0x11   :  { %25 = dma.hbm_to_vmem [thread:$0]  %s500_s2, 896, %s20_s13, [#allocation3], %s420_s22, %s420_s22, %s421_s23  }
  0x12   :  { %415 = dma.done.wait [#allocation3], 896  }
  0x13   :  { %416 = vsyncadd [#allocation3], 4294966400  ;;  %v35_v0 = vlaneseq  ;;  %v39_v6 = vld [vmem:[%s498_s0] sm:$0xff]  ;;  %v187_v16 = vld [vmem:[#allocation2 + $0x8] sm:$0xff]  ;;  %v422_v20 = vmov 0.0|0.0   ;;  %v423_v29 = vmov 0.0  }
  0x14   :  { %v186_v15 = vld [vmem:[#allocation2] sm:$0xff]  ;;  %351 = vmatprep.subr.bf16.mxu0 %v422_v20  ;;  %v188_v21 = vld [vmem:[#allocation2 + $0x10] sm:$0xff]  ;;  %v189_v22 = vld [vmem:[#allocation2 + $0x18] sm:$0xff]  ;;  %vm424_vm0 = vmmov 0   ;;  %v425_v32 = vmov 0   ;;  %vm120_vm1 = vcmask 457728  }
  0x15   :  { %v41_v1 = vshrl.u32 %v35_v0, 7  ;;  %v352_v19 = vpack.c.bf16 %v187_v16, %v186_v15  ;;  %v355_v25 = vpack.c.bf16 %v189_v22, %v188_v21  ;;  %v190_v26 = vld [vmem:[#allocation2 + $0x20] sm:$0xff]  ;;  %v191_v27 = vld [vmem:[#allocation2 + $0x28] sm:$0xff]  ;;  %v192_v30 = vld [vmem:[#allocation2 + $0x30] sm:$0xff]  ;;  %348 = vmatprep.mubr.msk.f32.mxu0 %vm424_vm0, %v423_v29  ;;  %368 = vset.pattern.permute.xlu0 %v425_v32  ;;  %v36_v34 = vand.u32 127, %v35_v0 }
  0x16   :  { %v358_v28 = vpack.c.bf16 %v191_v27, %v190_v26  ;;  %v292_v31 = vld [vmem:[%s499_s1] sm:$0xff]  ;;  %vm201_vm8 = vcmask 1041409   ;;  %vm203_vm11 = vcmask 1042434   ;;  %vm205_vm12 = vcmask 1043459   ;;  %s426_s1 = smov [#allocation5]  }
  0x17   :  { %v56_v2 = vsub.s32 2, %v41_v1  ;;  %v42_v3 = vsub.s32 0, %v41_v1  ;;  %v63_v4 = vsub.s32 3, %v41_v1  ;;  %v49_v5 = vsub.s32 1, %v41_v1  ;;  %353 = vmatpush3.bf16.msra.mxu0 %v352_v19  ;;  %s308_s28 = sshll.u32 %s426_s1, 4  ;;  %s309_s28 = int_to_ptr.vmem [resolvable:$true] %s308_s28 }
  0x18   :  { %v77_v11 = vsub.s32 5, %v41_v1  ;;  %v70_v12 = vsub.s32 4, %v41_v1  ;;  %v91_v13 = vsub.s32 7, %v41_v1  ;;  %v84_v14 = vsub.s32 6, %v41_v1  ;;  %354 = vmatprep.subr.bf16.mxu0 %v422_v20  ;;  %s393_s29 = scalar_lea.vmem %s309_s28, 128  ;;  %p398_p9 = scmp.lt.s32.totalorder %s309_s28, %s309_s28 }
  0x19   :  { %v57_v7 = vrot.slane %v39_v6, %v56_v2  ;;  %v43_v8 = vrot.slane %v39_v6, %v42_v3  ;;  %v64_v9 = vrot.slane %v39_v6, %v63_v4  ;;  %v50_v10 = vrot.slane %v39_v6, %v49_v5  ;;  %p394_p8 = scmp.ne.s32.totalorder %s309_s28, %s393_s29  ;;  %p399_p10 = scmp.lt.s32.totalorder %s393_s29, %s393_s29 }
  0x1a   :  { %v78_v17 = vrot.slane %v39_v6, %v77_v11  ;;  %v71_v18 = vrot.slane %v39_v6, %v70_v12  ;;  %v92_v23 = vrot.slane %v39_v6, %v91_v13  ;;  %v85_v24 = vrot.slane %v39_v6, %v84_v14 }
  0x1b   :  { %59 = vbcast.lane.b32.xlu1 %v57_v7, 256  ;;  %45 = vbcast.lane.b32.xlu0 %v43_v8, 256  ;;  %369 = vrcp.f32 %v292_v31  ;;  %vm207_vm13 = vcmask 1044484   ;;  %vm209_vm14 = vcmask 1045509   ;;  %vm211_vm15 = vcmask 1046534   ;;  %p400_p11 = por %p399_p10, %p398_p9 }
  0x1c   :  { %356 = vmatpush3.bf16.msra.mxu0 %v355_v25  ;;  %vm213_vm0 = vcmask 1047559  }
  0x1d   :  { %357 = vmatprep.subr.bf16.mxu0 %v422_v20  ;;  %p401_p12 = pnand %p400_p11, %p394_p8 }
  0x1f   :  { %66 = vbcast.lane.b32.xlu1 %v64_v9, 256  ;;  %52 = vbcast.lane.b32.xlu0 %v50_v10, 256 }
  0x20   :  { %359 = vmatpush3.bf16.msra.mxu0 %v358_v28 }
  0x21   :  { %346 = vmatprep.subr.mxu0 %v423_v29 }
  0x23   :  { %80 = vbcast.lane.b32.xlu1 %v78_v17, 256  ;;  %73 = vbcast.lane.b32.xlu0 %v71_v18, 256 }
  0x24   :  { %347 = vmatpush3.msra.mxu0 %v192_v30 }
  0x25   :  { %v370_v33 = vpop.eup %369 }
  0x27   :  { %94 = vbcast.lane.b32.xlu1 %v92_v23, 256  ;;  %87 = vbcast.lane.b32.xlu0 %v85_v24, 256 }
  0x2b   :  { %297 = vperm.xlu0 %368, %v370_v33  }
  0x8d   :  { %v60_v35 = vpop.permute.xlu1 %59  ;;  %v46_v36 = vpop.permute.xlu0 %45 }
  0x8e   :  { %vm98_vm2 = vcmp.eq.s32.totalorder %v60_v35, %v36_v34  ;;  %vm96_vm3 = vcmp.eq.s32.totalorder %v46_v36, %v36_v34 }
  0x8f   :  { %v319_v37 = vsel %vm98_vm2, 1.0, %v423_v29  ;;  %v317_v38 = vsel %vm96_vm3, 1.0, %v423_v29 }
  0x90   :  { %v135_v39 = vsel %vm120_vm1, %v319_v37, 0.0  ;;  %v121_v40 = vsel %vm120_vm1, %v317_v38, 0.0 }
  0x91   :  { %v136_v41 = vrot.slane %v135_v39, 4  ;;  %v122_v42 = vrot.slane %v121_v40, 4  ;;  %v67_v43 = vpop.permute.xlu1 %66  ;;  %v53_v44 = vpop.permute.xlu0 %52 }
  0x92   :  { %vm99_vm4 = vcmp.eq.s32.totalorder %v67_v43, %v36_v34  ;;  %vm97_vm5 = vcmp.eq.s32.totalorder %v53_v44, %v36_v34 }
  0x93   :  { %v137_v45 = vadd.f32 %v136_v41, %v135_v39  ;;  %v123_v46 = vadd.f32 %v122_v42, %v121_v40  ;;  %v320_v47 = vsel %vm99_vm4, 1.0, %v423_v29  ;;  %v318_v48 = vsel %vm97_vm5, 1.0, %v423_v29 }
  0x94   :  { %v142_v49 = vsel %vm120_vm1, %v320_v47, 0.0  ;;  %v128_v50 = vsel %vm120_vm1, %v318_v48, 0.0 }
  0x95   :  { %v138_v51 = vrot.slane %v137_v45, 2  ;;  %v124_v52 = vrot.slane %v123_v46, 2  ;;  %v143_v53 = vrot.slane %v142_v49, 4  ;;  %v129_v54 = vrot.slane %v128_v50, 4  ;;  %v81_v55 = vpop.permute.xlu1 %80  ;;  %v74_v56 = vpop.permute.xlu0 %73 }
  0x96   :  { %vm101_vm6 = vcmp.eq.s32.totalorder %v81_v55, %v36_v34  ;;  %vm100_vm7 = vcmp.eq.s32.totalorder %v74_v56, %v36_v34 }
  0x97   :  { %v139_v57 = vadd.f32 %v138_v51, %v137_v45  ;;  %v125_v58 = vadd.f32 %v124_v52, %v123_v46  ;;  %v144_v59 = vadd.f32 %v143_v53, %v142_v49  ;;  %v130_v60 = vadd.f32 %v129_v54, %v128_v50 }
  0x98   :  { %v322_v61 = vsel %vm101_vm6, 1.0, %v423_v29  ;;  %v321_v62 = vsel %vm100_vm7, 1.0, %v423_v29 }
  0x99   :  { %v145_v63 = vrot.slane %v144_v59, 2  ;;  %v131_v0 = vrot.slane %v130_v60, 2  ;;  %v95_v1 = vpop.permute.xlu1 %94  ;;  %v88_v2 = vpop.permute.xlu0 %87  ;;  %v156_v3 = vsel %vm120_vm1, %v322_v61, 0.0  ;;  %v149_v4 = vsel %vm120_vm1, %v321_v62, 0.0 }
  0x9a   :  { %vm103_vm9 = vcmp.eq.s32.totalorder %v95_v1, %v36_v34  ;;  %vm102_vm10 = vcmp.eq.s32.totalorder %v88_v2, %v36_v34  ;;  %v140_v5 = vrot.slane %v139_v57, 1  ;;  %v126_v6 = vrot.slane %v125_v58, 1 }
  0x9b   :  { %v146_v7 = vadd.f32 %v145_v63, %v144_v59  ;;  %v132_v8 = vadd.f32 %v131_v0, %v130_v60  ;;  %v157_v9 = vrot.slane %v156_v3, 4  ;;  %v150_v10 = vrot.slane %v149_v4, 4 }
  0x9c   :  { %v324_v11 = vsel %vm103_vm9, 1.0, %v423_v29  ;;  %v323_v12 = vsel %vm102_vm10, 1.0, %v423_v29  ;;  %v141_v20 = vadd.f32 %v140_v5, %v139_v57  ;;  %v127_v21 = vadd.f32 %v126_v6, %v125_v58 }
  0x9d   :  { %v133_v13 = vrot.slane %v132_v8, 1  ;;  %v170_v14 = vsel %vm120_vm1, %v324_v11, 0.0  ;;  %v163_v15 = vsel %vm120_vm1, %v323_v12, 0.0  ;;  %v158_v16 = vadd.f32 %v157_v9, %v156_v3 }
  0x9e   :  { %v151_v17 = vadd.f32 %v150_v10, %v149_v4  ;;  %v171_v18 = vrot.slane %v170_v14, 4  ;;  %v164_v19 = vrot.slane %v163_v15, 4  ;;  %v147_v22 = vrot.slane %v146_v7, 1 }
  0x9f   :  { %v134_v23 = vadd.f32 %v133_v13, %v132_v8  ;;  %v159_v24 = vrot.slane %v158_v16, 2 }
  0xa0   :  { %v152_v25 = vrot.slane %v151_v17, 2  ;;  %v172_v26 = vadd.f32 %v171_v18, %v170_v14  ;;  %v165_v27 = vadd.f32 %v164_v19, %v163_v15  ;;  %v148_v33 = vadd.f32 %v147_v22, %v146_v7 }
  0xa1   :  { %v202_v28 = vsel %vm201_vm8, %v134_v23, %v127_v21  ;;  %v160_v30 = vadd.f32 %v159_v24, %v158_v16 }
  0xa2   :  { %v204_v29 = vsel %vm203_vm11, %v141_v20, %v202_v28  ;;  %v153_v31 = vadd.f32 %v152_v25, %v151_v17  ;;  %v173_v32 = vrot.slane %v172_v26, 2  ;;  %v166_v34 = vrot.slane %v165_v27, 2 }
  0xa3   :  { %v161_v35 = vrot.slane %v160_v30, 1  ;;  %v206_v39 = vsel %vm205_vm12, %v148_v33, %v204_v29 }
  0xa4   :  { %v154_v36 = vrot.slane %v153_v31, 1  ;;  %v174_v37 = vadd.f32 %v173_v32, %v172_v26  ;;  %v167_v38 = vadd.f32 %v166_v34, %v165_v27 }
  0xa5   :  { %v162_v40 = vadd.f32 %v161_v35, %v160_v30 }
  0xa6   :  { %v155_v41 = vadd.f32 %v154_v36, %v153_v31  ;;  %v175_v42 = vrot.slane %v174_v37, 1  ;;  %v168_v43 = vrot.slane %v167_v38, 1 }
  0xa8   :  { %v176_v44 = vadd.f32 %v175_v42, %v174_v37  ;;  %v208_v45 = vsel %vm207_vm13, %v155_v41, %v206_v39  ;;  %v169_v46 = vadd.f32 %v168_v43, %v167_v38 }
  0xa9   :  { %v210_v47 = vsel %vm209_vm14, %v162_v40, %v208_v45 }
  0xaa   :  { %v212_v48 = vsel %vm211_vm15, %v169_v46, %v210_v47  ;;  %v298_v51 = vpop.permute.xlu0 %297 }
  0xab   :  { %v214_v49 = vsel %vm213_vm0, %v176_v44, %v212_v48 }
  0xac   :  { %349 = vmatmul.mubr.msk.f32.vlgmr.msra.gmra.mrb[0].mxu0 %vm120_vm1, %v214_v49 }
 0x17f   :  { %v283_v50 = vpop.f32.mrb[0].mxu0 }
 0x180   :  { %v350_v52 = vpop.f32.mrb[1].mxu0  ;;  %v300_v53 = vmul.f32 %v298_v51, %v283_v50 }
 0x182   :  { %301 = vst [vmem:[#allocation5] sm:$0xff] %v300_v53 }
 0x183   :  { %404 = shalt.err (!%p401_p12)
}
 0x184   :  { %s405_s5 = scalar_lea.hbm %s501_s3, 128 }
 0x185   :  { %p406_p13 = scmp.ne.s32.totalorder %s501_s3, %s405_s5  ;;  %p409_p0 = scmp.lt.u32.totalorder %s405_s5, %s501_s3 }
 0x187   :  { %p411_p1 = pnand %p409_p0, %p406_p13 }
 0x189   :  { %414 = shalt.err (!%p411_p1)
}
 0x18a   :  { %311 = dma.vmem_to_hbm [thread:$0]  %s309_s28, 128, %s501_s3, [#allocation4]  }
 0x18b   :  { %417 = dma.done.wait [#allocation4], 128  }
 0x18c   :  { %418 = vsyncadd [#allocation4], 4294967168 }
 0x18d   :  { %315 = vsyncpa [#allocation3], 1 }
 0x18e   :  { %316 = vsyncpa [#allocation4], 1 }

</bundles_post_ra>
